<compile_context>
chip_gen: v7x
topology: tpu7x:2x2x1
jax: 0.10.0
libtpu: 0.0.40
codegen_flags: <defaults>
</compile_context>

<pallas_src>
import functools

import jax
import jax.numpy as jnp
from jax.experimental import pallas as pl
from jax.experimental.pallas import tpu as pltpu


def _round_up(n, m):
    return ((n + m - 1) // m) * m


def _pick_tt(T, max_tt=8):
    """Largest divisor of T that is <= max_tt (timesteps per grid iteration)."""
    tt = min(T, max_tt)
    while T % tt:
        tt -= 1
    return tt


def _sigmoid(x):
    # sigmoid(x) == 0.5 * (tanh(x/2) + 1): one EUP push instead of exp+divide.
    return 0.5 * jnp.tanh(0.5 * x) + 0.5


# -----------------------------------------------------------------------------
# Recurrent kernel: a block of Tt GRU steps per grid iteration.
# -----------------------------------------------------------------------------
def gru_seq_kernel(gx_ref, h0_ref, whh_ref, bhn_ref, o_ref, h_ref):
    """Recurrent part of the GRU for one block of Tt timesteps.

    gx_ref : (Tt, B, 3Hp) f32   precomputed  x @ W_ih^T + folded biases (gate-padded)
    h0_ref : (B, Hp)      f32   initial hidden state (used only at grid step 0)
    whh_ref: (Hp, 3Hp)    bf16  packed [W_hr^T | W_hz^T | W_hn^T], zero-padded
    bhn_ref: (1, Hp)      f32   b_hn, zero-padded
    o_ref  : (Tt, B, Hp)  f32   per-step hidden outputs
    h_ref  : (B, Hp)      f32   VMEM scratch carrying h across grid steps
    """
    @pl.when(pl.program_id(0) == 0)
    def _():
        h_ref[...] = h0_ref[...]

    Hp = h_ref.shape[1]
    Tt = gx_ref.shape[0]
    w = whh_ref[...]          # stays VMEM-resident; bf16 MXU operand
    bhn = bhn_ref[...]

    def step(i, h):
        gx = gx_ref[i]                                          # (B, 3Hp) f32
        gh = jnp.dot(h.astype(jnp.bfloat16), w,
                     preferred_element_type=jnp.float32)        # (B, 3Hp) f32
        r = _sigmoid(gx[:, 0 * Hp:1 * Hp] + gh[:, 0 * Hp:1 * Hp])
        z = _sigmoid(gx[:, 1 * Hp:2 * Hp] + gh[:, 1 * Hp:2 * Hp])
        n = jnp.tanh(gx[:, 2 * Hp:3 * Hp] + r * (gh[:, 2 * Hp:3 * Hp] + bhn))
        h_new = (1.0 - z) * n + z * h
        o_ref[i] = h_new
        return h_new

    h_ref[...] = jax.lax.fori_loop(0, Tt, step, h_ref[...], unroll=True)


# -----------------------------------------------------------------------------
# Host-side wrapper: one dispatch per sequence (forward() uses T == 1).
# -----------------------------------------------------------------------------
@functools.partial(jax.jit, static_argnames=("h_dim",))
def _gru_sequence(xs, h0_pad, w_i_packed, w_hh_packed, b_all, b_hn, *, h_dim):
    T, B, I = xs.shape
    Hp = h0_pad.shape[1]
    G3 = w_hh_packed.shape[1]            # 3 * Hp

    # --- Hoisted input projection: one matmul with M = T*B rows (fills MXU),
    #     biases (b_ih + b_hh for r/z, b_in for n) folded in.
    gx = jnp.dot(xs.reshape(T * B, I).astype(jnp.bfloat16), w_i_packed,
                 preferred_element_type=jnp.float32) + b_all
    gx = gx.reshape(T, B, G3)

    # --- Blocked recurrence: Tt steps per grid iteration.
    Tt = _pick_tt(T)
    nblk = T // Tt

    # VMEM budget: raise the scoped limit only when the resident footprint is
    # non-trivial (v5e default is 16 MiB); cap below v7x's 64 MiB physical.
    whh_bytes = Hp * G3 * 2
    blk_bytes = Tt * B * (G3 + Hp) * 4
    need = 2 * blk_bytes + 2 * whh_bytes + 2 * B * Hp * 4 + (2 << 20)
    cp_kwargs = dict(dimension_semantics=("arbitrary",))
    if need > (16 << 20):
        cp_kwargs["vmem_limit_bytes"] = min(need, 60 << 20)

    outs_pad = pl.pallas_call(
        gru_seq_kernel,
        out_shape=jax.ShapeDtypeStruct((T, B, Hp), jnp.float32),
        grid=(nblk,),
        in_specs=[
            pl.BlockSpec((Tt, B, G3), lambda t: (t, 0, 0)),
            pl.BlockSpec((B, Hp), lambda t: (0, 0)),      # h0 (read at t == 0)
            pl.BlockSpec((Hp, G3), lambda t: (0, 0)),     # recurrent weight
            pl.BlockSpec((1, Hp), lambda t: (0, 0)),      # b_hn
        ],
        out_specs=pl.BlockSpec((Tt, B, Hp), lambda t: (t, 0, 0)),
        scratch_shapes=[pltpu.VMEM((B, Hp), jnp.float32)],   # carried hidden
        compiler_params=pltpu.CompilerParams(**cp_kwargs),
    )(gx, h0_pad, w_hh_packed, b_hn)

    return outs_pad[:, :, :h_dim], outs_pad[-1]


# -----------------------------------------------------------------------------
# Module
# -----------------------------------------------------------------------------
class RNN:
    """JAX/Pallas port of the PyTorch RNN module (stateful GRUCell)."""

    def __init__(self, inout, key):
        inputs, outputs = inout
        self.I = inputs
        self.H = outputs
        self.Hp = _round_up(outputs, 128)

        # torch.nn.GRUCell default init: U(-1/sqrt(hidden), 1/sqrt(hidden))
        k = 1.0 / (outputs ** 0.5)
        k1, k2, k3, k4 = jax.random.split(key, 4)
        self.w_ih = jax.random.uniform(k1, (3 * outputs, inputs), jnp.float32, -k, k)
        self.w_hh = jax.random.uniform(k2, (3 * outputs, outputs), jnp.float32, -k, k)
        self.b_ih = jax.random.uniform(k3, (3 * outputs,), jnp.float32, -k, k)
        self.b_hh = jax.random.uniform(k4, (3 * outputs,), jnp.float32, -k, k)

        # ---- one-time packing into lane-dense kernel layouts ----
        H, Hp = self.H, self.Hp

        def pad_gate(m):  # (rows, H) -> (rows, Hp), zero-padded lanes
            return jnp.pad(m, ((0, 0), (0, Hp - H)))

        wih_t = self.w_ih.T                          # (I, 3H)
        whh_t = self.w_hh.T                          # (H, 3H)

        # Input-projection weight (used ONCE per sequence): (I, 3Hp) bf16.
        self.w_i_packed = jnp.concatenate(
            [pad_gate(wih_t[:, g * H:(g + 1) * H]) for g in range(3)],
            axis=1).astype(jnp.bfloat16)

        # Recurrent weight (used EVERY step): (Hp, 3Hp) bf16, zero row-padded.
        hh = jnp.concatenate(
            [pad_gate(whh_t[:, g * H:(g + 1) * H]) for g in range(3)], axis=1)
        self.w_hh_packed = jnp.pad(hh, ((0, Hp - H), (0, 0))).astype(jnp.bfloat16)

        # Biases folded into the hoisted input projection (b_hn kept separate:
        # it multiplies r inside the n-gate).
        self.b_all = jnp.concatenate([
            pad_gate((self.b_ih[0 * H:1 * H] + self.b_hh[0 * H:1 * H])[None, :]),
            pad_gate((self.b_ih[1 * H:2 * H] + self.b_hh[1 * H:2 * H])[None, :]),
            pad_gate((self.b_ih[2 * H:3 * H])[None, :]),
        ], axis=1).astype(jnp.float32)                            # (1, 3Hp)
        self.b_hn = pad_gate(self.b_hh[2 * H:3 * H][None, :]).astype(jnp.float32)

        # Stateful hidden (torch: self.hn = torch.zeros(outputs)).
        self.hn = jnp.zeros((outputs,), jnp.float32)
        self._hn_pad = None                          # padded (B, Hp) device state

    def reset(self):
        self.hn = jnp.zeros((self.H,), jnp.float32)
        self._hn_pad = None

    def _ensure_state(self, batch):
        if self._hn_pad is None or self._hn_pad.shape[0] != batch:
            hn = self.hn
            if hn.ndim == 1:
                hn = jnp.broadcast_to(hn, (batch, self.H))
            elif hn.shape[0] != batch:
                raise ValueError("batch size changed; call reset() first")
            self._hn_pad = jnp.pad(
                hn, ((0, 0), (0, self.Hp - self.H))).astype(jnp.float32)

    def forward(self, x):
        # NOTE: for host-side recurrent loops prefer forward_sequence(); each
        # forward() call pays dispatch + weight DMA for a single step.
        x = jnp.asarray(x, jnp.float32)
        B = x.shape[0]
        self._ensure_state(B)
        outs, last_pad = _gru_sequence(x[None], self._hn_pad, self.w_i_packed,
                                       self.w_hh_packed, self.b_all, self.b_hn,
                                       h_dim=self.H)
        self._hn_pad = last_pad
        self.hn = outs[0]                 # stateful update, like the PyTorch module
        return outs[0]

    def forward_sequence(self, xs):
        """Fused T-step loop: equivalent to calling forward() on each xs[t]."""
        xs = jnp.asarray(xs, jnp.float32)
        T, B, _ = xs.shape
        self._ensure_state(B)
        outs, last_pad = _gru_sequence(xs, self._hn_pad, self.w_i_packed,
                                       self.w_hh_packed, self.b_all, self.b_hn,
                                       h_dim=self.H)
        self._hn_pad = last_pad
        self.hn = outs[-1]
        return outs


# -----------------------------------------------------------------------------
# Pure-JAX reference (torch.nn.GRUCell semantics) for correctness checking.
# -----------------------------------------------------------------------------
def _gru_ref(x, h, w_ih, w_hh, b_ih, b_hh):
    H = h.shape[1]
    gi = x @ w_ih.T + b_ih
    gh = h @ w_hh.T + b_hh
    i_r, i_z, i_n = gi[:, :H], gi[:, H:2 * H], gi[:, 2 * H:]
    h_r, h_z, h_n = gh[:, :H], gh[:, H:2 * H], gh[:, 2 * H:]
    r = jax.nn.sigmoid(i_r + h_r)
    z = jax.nn.sigmoid(i_z + h_z)
    n = jnp.tanh(i_n + r * h_n)
    return (1.0 - z) * n + z * h


if __name__ == "__main__":
    key = jax.random.PRNGKey(0)
    k_param, k_x1, k_x2, k_seq = jax.random.split(key, 4)

    batch, inputs, hidden = 8, 16, 32
    model = RNN((inputs, hidden), k_param)

    # bf16 MXU operands (f32 accumulation) -> loosened tolerance.
    tol = dict(atol=5e-2, rtol=5e-2)

    # --- single-step path (the module's forward) ---
    x1 = jax.random.normal(k_x1, (batch, inputs), jnp.float32)
    x2 = jax.random.normal(k_x2, (batch, inputs), jnp.float32)

    out1 = model.forward(x1)
    out2 = model.forward(x2)              # exercises the recurrent state
    out2 = jax.block_until_ready(out2)

    h0 = jnp.zeros((batch, hidden), jnp.float32)
    ref1 = _gru_ref(x1, h0, model.w_ih, model.w_hh, model.b_ih, model.b_hh)
    ref2 = _gru_ref(x2, ref1, model.w_ih, model.w_hh, model.b_ih, model.b_hh)

    assert out1.shape == (batch, hidden)
    assert jnp.allclose(out1, ref1, **tol)
    assert jnp.allclose(out2, ref2, **tol)

    # --- fused-sequence path: Tt-blocked grid (T=16 -> Tt=8, 2 grid steps,
    #     exercising both the intra-block loop and the cross-block h carry) ---
    model.reset()
    T = 16
    xs = jax.random.normal(k_seq, (T, batch, inputs), jnp.float32)
    outs = jax.block_until_ready(model.forward_sequence(xs))
    assert outs.shape == (T, batch, hidden)

    h = jnp.zeros((batch, hidden), jnp.float32)
    for t in range(T):
        h = _gru_ref(xs[t], h, model.w_ih, model.w_hh, model.b_ih, model.b_hh)
        assert jnp.allclose(outs[t], h, **tol)
    assert jnp.allclose(model.hn, h, **tol)

    print("KERNEL_OK")
</pallas_src>

<mosaic_0001>
module attributes {stable_mosaic.version = 11 : i64} {
  func.func @gru_seq_kernel(%arg0: i32, %arg1: memref<1x8x384xf32, #tpu.memory_space<vmem>>, %arg2: memref<8x128xf32, #tpu.memory_space<vmem>>, %arg3: memref<128x384xbf16, #tpu.memory_space<vmem>>, %arg4: memref<1x128xf32, #tpu.memory_space<vmem>>, %arg5: memref<1x8x128xf32, #tpu.memory_space<vmem>>, %arg6: memref<8x128xf32, #tpu.memory_space<vmem>>) attributes {dimension_semantics = [#tpu.dimension_semantics<arbitrary>], iteration_bounds = array<i64: 1>, scalar_prefetch = 0 : i64, scratch_operands = 1 : i64, tpu.core_type = #tpu.core_type<tc>, window_params = [{transform_indices = @transform_0, window_bounds = array<i64: 1, 8, 384>}, {pipeline_mode = #tpu.pipeline_mode<synchronous>, transform_indices = @transform_1, window_bounds = array<i64: 8, 128>}, {pipeline_mode = #tpu.pipeline_mode<synchronous>, transform_indices = @transform_2, window_bounds = array<i64: 128, 384>}, {pipeline_mode = #tpu.pipeline_mode<synchronous>, transform_indices = @transform_3, window_bounds = array<i64: 1, 128>}, {transform_indices = @transform_4, window_bounds = array<i64: 1, 8, 128>}]} {
    %c0_i32 = arith.constant 0 : i32
    %0 = arith.cmpi eq, %arg0, %c0_i32 : i32
    %1 = arith.extui %0 : i1 to i32
    %c0_i32_0 = arith.constant 0 : i32
    %2 = arith.cmpi ne, %1, %c0_i32_0 : i32
    scf.if %2 {
      %c0_20 = arith.constant 0 : index
      %c0_21 = arith.constant 0 : index
      %48 = vector.load %arg2[%c0_20, %c0_21] : memref<8x128xf32, #tpu.memory_space<vmem>>, vector<8x128xf32>
      %c0_22 = arith.constant 0 : index
      %c0_23 = arith.constant 0 : index
      %49 = vector.load %arg6[%c0_22, %c0_23] : memref<8x128xf32, #tpu.memory_space<vmem>>, vector<8x128xf32>
      tpu.vector_store %arg6[%c0_22, %c0_23], %48 {strides = array<i32>} : memref<8x128xf32, #tpu.memory_space<vmem>>, vector<8x128xf32>,
    } else {
    }
    %c0 = arith.constant 0 : index
    %c0_1 = arith.constant 0 : index
    %3 = vector.load %arg3[%c0, %c0_1] : memref<128x384xbf16, #tpu.memory_space<vmem>>, vector<128x384xbf16>
    %c0_2 = arith.constant 0 : index
    %c0_3 = arith.constant 0 : index
    %4 = vector.load %arg4[%c0_2, %c0_3] : memref<1x128xf32, #tpu.memory_space<vmem>>, vector<1x128xf32>
    %c0_4 = arith.constant 0 : index
    %c0_5 = arith.constant 0 : index
    %5 = vector.load %arg6[%c0_4, %c0_5] : memref<8x128xf32, #tpu.memory_space<vmem>>, vector<8x128xf32>
    %c0_i32_6 = arith.constant 0 : i32
    %6 = arith.index_cast %c0_i32_6 : i32 to index
    %c0_7 = arith.constant 0 : index
    %c0_8 = arith.constant 0 : index
    %7 = vector.load %arg1[%6, %c0_7, %c0_8] : memref<1x8x384xf32, #tpu.memory_space<vmem>>, vector<1x8x384xf32>
    %8 = vector.shape_cast %7 : vector<1x8x384xf32> to vector<8x384xf32>
    %9 = arith.truncf %5 : vector<8x128xf32> to vector<8x128xbf16>
    %cst = arith.constant dense<0.000000e+00> : vector<8x384xf32>
    %10 = tpu.matmul %9, %3, %cst {dimension_numbers = #tpu.dot_dimension_numbers<[1], [0], [0], [1], [0, 0, 1, 1], [], []>} : vector<8x128xbf16>, vector<128x384xbf16>, vector<8x384xf32> -> vector<8x384xf32>
    %11 = vector.extract_strided_slice %8 {offsets = [0, 0], sizes = [8, 128], strides = [1, 1]} : vector<8x384xf32> to vector<8x128xf32>
    %12 = vector.extract_strided_slice %10 {offsets = [0, 0], sizes = [8, 128], strides = [1, 1]} : vector<8x384xf32> to vector<8x128xf32>
    %13 = arith.addf %11, %12 : vector<8x128xf32>
    %cst_9 = arith.constant 5.000000e-01 : f32
    %14 = vector.broadcast %cst_9 : f32 to vector<8x128xf32>
    %15 = arith.mulf %14, %13 : vector<8x128xf32>
    %16 = math.tanh %15 : vector<8x128xf32>
    %cst_10 = arith.constant 5.000000e-01 : f32
    %17 = vector.broadcast %cst_10 : f32 to vector<8x128xf32>
    %18 = arith.mulf %17, %16 : vector<8x128xf32>
    %cst_11 = arith.constant 5.000000e-01 : f32
    %19 = vector.broadcast %cst_11 : f32 to vector<8x128xf32>
    %20 = arith.addf %18, %19 : vector<8x128xf32>
    %21 = vector.extract_strided_slice %8 {offsets = [0, 128], sizes = [8, 128], strides = [1, 1]} : vector<8x384xf32> to vector<8x128xf32>
    %22 = vector.extract_strided_slice %10 {offsets = [0, 128], sizes = [8, 128], strides = [1, 1]} : vector<8x384xf32> to vector<8x128xf32>
    %23 = arith.addf %21, %22 : vector<8x128xf32>
    %cst_12 = arith.constant 5.000000e-01 : f32
    %24 = vector.broadcast %cst_12 : f32 to vector<8x128xf32>
    %25 = arith.mulf %24, %23 : vector<8x128xf32>
    %26 = math.tanh %25 : vector<8x128xf32>
    %cst_13 = arith.constant 5.000000e-01 : f32
    %27 = vector.broadcast %cst_13 : f32 to vector<8x128xf32>
    %28 = arith.mulf %27, %26 : vector<8x128xf32>
    %cst_14 = arith.constant 5.000000e-01 : f32
    %29 = vector.broadcast %cst_14 : f32 to vector<8x128xf32>
    %30 = arith.addf %28, %29 : vector<8x128xf32>
    %31 = vector.extract_strided_slice %8 {offsets = [0, 256], sizes = [8, 128], strides = [1, 1]} : vector<8x384xf32> to vector<8x128xf32>
    %32 = vector.extract_strided_slice %10 {offsets = [0, 256], sizes = [8, 128], strides = [1, 1]} : vector<8x384xf32> to vector<8x128xf32>
    %33 = vector.broadcast %4 : vector<1x128xf32> to vector<8x128xf32>
    %34 = arith.addf %32, %33 : vector<8x128xf32>
    %35 = arith.mulf %20, %34 : vector<8x128xf32>
    %36 = arith.addf %31, %35 : vector<8x128xf32>
    %37 = math.tanh %36 : vector<8x128xf32>
    %cst_15 = arith.constant 1.000000e+00 : f32
    %38 = vector.broadcast %cst_15 : f32 to vector<8x128xf32>
    %39 = arith.subf %38, %30 : vector<8x128xf32>
    %40 = arith.mulf %39, %37 : vector<8x128xf32>
    %41 = arith.mulf %30, %5 : vector<8x128xf32>
    %42 = arith.addf %40, %41 : vector<8x128xf32>
    %43 = arith.index_cast %c0_i32_6 : i32 to index
    %c0_16 = arith.constant 0 : index
    %c0_17 = arith.constant 0 : index
    %44 = vector.load %arg5[%43, %c0_16, %c0_17] : memref<1x8x128xf32, #tpu.memory_space<vmem>>, vector<1x8x128xf32>
    %45 = vector.shape_cast %44 : vector<1x8x128xf32> to vector<8x128xf32>
    %46 = vector.shape_cast %42 : vector<8x128xf32> to vector<1x8x128xf32>
    tpu.vector_store %arg5[%43, %c0_16, %c0_17], %46 {strides = array<i32>} : memref<1x8x128xf32, #tpu.memory_space<vmem>>, vector<1x8x128xf32>,
    %c1_i32 = arith.constant 1 : i32
    %c0_18 = arith.constant 0 : index
    %c0_19 = arith.constant 0 : index
    %47 = vector.load %arg6[%c0_18, %c0_19] : memref<8x128xf32, #tpu.memory_space<vmem>>, vector<8x128xf32>
    tpu.vector_store %arg6[%c0_18, %c0_19], %42 {strides = array<i32>} : memref<8x128xf32, #tpu.memory_space<vmem>>, vector<8x128xf32>,
    return
  }
  func.func @transform_0(%arg0: i32) -> (i32, i32, i32) {
    %c0_i32 = arith.constant 0 : i32
    %c0_i32_0 = arith.constant 0 : i32
    %c0_i32_1 = arith.constant 0 : i32
    return %arg0, %c0_i32, %c0_i32_0 : i32, i32, i32
  }
  func.func @transform_1(%arg0: i32) -> (i32, i32) {
    %c0_i32 = arith.constant 0 : i32
    %c0_i32_0 = arith.constant 0 : i32
    %c0_i32_1 = arith.constant 0 : i32
    return %c0_i32, %c0_i32_0 : i32, i32
  }
  func.func @transform_2(%arg0: i32) -> (i32, i32) {
    %c0_i32 = arith.constant 0 : i32
    %c0_i32_0 = arith.constant 0 : i32
    %c0_i32_1 = arith.constant 0 : i32
    return %c0_i32, %c0_i32_0 : i32, i32
  }
  func.func @transform_3(%arg0: i32) -> (i32, i32) {
    %c0_i32 = arith.constant 0 : i32
    %c0_i32_0 = arith.constant 0 : i32
    %c0_i32_1 = arith.constant 0 : i32
    return %c0_i32, %c0_i32_0 : i32, i32
  }
  func.func @transform_4(%arg0: i32) -> (i32, i32, i32) {
    %c0_i32 = arith.constant 0 : i32
    %c0_i32_0 = arith.constant 0 : i32
    %c0_i32_1 = arith.constant 0 : i32
    return %arg0, %c0_i32, %c0_i32_0 : i32, i32, i32
  }
}

</mosaic_0001>

<bundles_post_ra>
// kernel: _gru_sequence.1
= control target key start
LH: loop header
LB: loop body
LE: loop exit
PB: predicated region body
PF: predicated region fallthrough
CT: control target
= control target key end

     0   :  { %9 = vsyncpa [#allocation4], 0  ;;  %s438_s15 = smov [#allocation3]   ;;  %s499_s0 = inlined_call_operand.vmem [shape: f32[1,8,384], index: 0, kind: input, shape index: {}]   ;;  %s500_s1 = inlined_call_operand.vmem [shape: f32[8,128], index: 1, kind: input, shape index: {}]   ;;  %s501_s2 = inlined_call_operand.hbm [shape: bf16[128,384], index: 2, kind: input, shape index: {}]   ;;  %s502_s3 = inlined_call_operand.vmem [shape: f32[1,128], index: 3, kind: input, shape index: {}]   ;;  %s503_s4 = inlined_call_operand.vmem [shape: f32[1,8,128], index: 4, kind: output, shape index: {}]  }
   0x1   :  { %s19_s16 = sshll.u32 %s438_s15, 4  ;;  %s414_s19 = scalar_lea.hbm %s501_s2, 3072  ;;  %s20_s16 = int_to_ptr.vmem [resolvable:$true] %s19_s16 }
   0x2   :  { %p415_p0 = scmp.ne.s32.totalorder %s501_s2, %s414_s19  ;;  %p418_p1 = scmp.lt.u32.totalorder %s414_s19, %s501_s2 }
   0x4   :  { %p420_p2 = pnand %p418_p1, %p415_p0 }
   0x6   :  { %423 = shalt.err (!%p420_p2)
}
   0x7   :  { %s424_s24 = scalar_lea.vmem %s20_s16, 3072  ;;  %p429_p4 = scmp.lt.s32.totalorder %s20_s16, %s20_s16 }
   0x8   :  { %p425_p3 = scmp.ne.s32.totalorder %s20_s16, %s424_s24  ;;  %p430_p5 = scmp.lt.s32.totalorder %s424_s24, %s424_s24 }
   0xa   :  { %p431_p6 = por %p430_p5, %p429_p4 }
   0xc   :  { %p432_p7 = pnand %p431_p6, %p425_p3 }
   0xe   :  { %435 = shalt.err (!%p432_p7)
}
   0xf   :  { %s439_s25 = smov 192   ;;  %s440_s26 = smov 12  }
  0x10   :  { %25 = dma.hbm_to_vmem [thread:$0]  %s501_s2, 3072, %s20_s16, [#allocation4], %s439_s25, %s439_s25, %s440_s26  }
  0x11   :  { %436 = dma.done.wait [#allocation4], 3072  }
  0x12   :  { %437 = vsyncadd [#allocation4], 4294964224  ;;  %v441_v0 = vmov 0.0   ;;  %v442_v1 = vmov 0   ;;  %vm443_vm0 = vmmov 0   ;;  %v36_v24 = vld [vmem:[%s500_s1] sm:$0xff] }
  0x13   :  { %350 = vmatprep.subr.bf16.mxu1 %v441_v0  ;;  %236 = vmatprep.mubr.bf16.mxu0 %v442_v1  ;;  %v376_v2 = vld [vmem:[#allocation3 + $0x4] ss:$12 sps:$4 sm:$0xff]   ;;  %v378_v3 = vld [vmem:[#allocation3] ss:$12 sps:$4 sm:$0xff]   ;;  %v379_v4 = vld [vmem:[#allocation3 + $0x1c] ss:$12 sps:$4 sm:$0xff]   ;;  %v75_v26 = vpack.c.bf16 %v36_v24, %v36_v24 }
  0x14   :  { %366 = vmatprep.mubr.msk.bf16.mxu1 %vm443_vm0, %v441_v0  ;;  %204 = vmatprep.subr.bf16.mxu0 %v376_v2  ;;  %v381_v5 = vld [vmem:[#allocation3 + $0x18] ss:$12 sps:$4 sm:$0xff]   ;;  %v382_v6 = vld [vmem:[#allocation3 + $0x34] ss:$12 sps:$4 sm:$0xff]   ;;  %v384_v8 = vld [vmem:[#allocation3 + $0x30] ss:$12 sps:$4 sm:$0xff]  }
  0x15   :  { %205 = vmatpush1.bf16.msra.mxu0 %v378_v3  ;;  %v388_v7 = vld [vmem:[#allocation3 + $0x8] ss:$12 sps:$4 sm:$0xff]   ;;  %v385_v9 = vld [vmem:[#allocation3 + $0x4c] ss:$12 sps:$4 sm:$0xff]   ;;  %v389_v12 = vld [vmem:[#allocation3 + $0x64] ss:$12 sps:$4 sm:$0xff]  }
  0x16   :  { %206 = vmatprep.subr.bf16.mxu0 %v379_v4  ;;  %351 = vmatpush3.bf16.msra.mxu1 %v388_v7  ;;  %v392_v10 = vld [vmem:[#allocation3 + $0x20] ss:$12 sps:$4 sm:$0xff]   ;;  %v387_v11 = vld [vmem:[#allocation3 + $0x48] ss:$12 sps:$4 sm:$0xff]   ;;  %v396_v13 = vld [vmem:[#allocation3 + $0x38] ss:$12 sps:$4 sm:$0xff]  }
  0x17   :  { %352 = vmatprep.subr.bf16.mxu1 %v441_v0  ;;  %v391_v14 = vld [vmem:[#allocation3 + $0x60] ss:$12 sps:$4 sm:$0xff]   ;;  %v393_v15 = vld [vmem:[#allocation3 + $0x7c] ss:$12 sps:$4 sm:$0xff]   ;;  %v395_v17 = vld [vmem:[#allocation3 + $0x78] ss:$12 sps:$4 sm:$0xff]  }
  0x18   :  { %v400_v16 = vld [vmem:[#allocation3 + $0x50] ss:$12 sps:$4 sm:$0xff]   ;;  %v397_v18 = vld [vmem:[#allocation3 + $0x94] ss:$12 sps:$4 sm:$0xff]   ;;  %v401_v21 = vld [vmem:[#allocation3 + $0xac] ss:$12 sps:$4 sm:$0xff]  }
  0x19   :  { %207 = vmatpush1.bf16.msra.mxu0 %v381_v5  ;;  %v404_v19 = vld [vmem:[#allocation3 + $0x68] ss:$12 sps:$4 sm:$0xff]   ;;  %v399_v20 = vld [vmem:[#allocation3 + $0x90] ss:$12 sps:$4 sm:$0xff]   ;;  %v405_v22 = vld [vmem:[#allocation3 + $0x80] ss:$12 sps:$4 sm:$0xff]  }
  0x1a   :  { %208 = vmatprep.subr.bf16.mxu0 %v382_v6  ;;  %353 = vmatpush3.bf16.msra.mxu1 %v392_v10  ;;  %v403_v23 = vld [vmem:[#allocation3 + $0xa8] ss:$12 sps:$4 sm:$0xff]   ;;  %v406_v25 = vld [vmem:[#allocation3 + $0x98] ss:$12 sps:$4 sm:$0xff]   ;;  %v407_v27 = vld [vmem:[#allocation3 + $0xb0] ss:$12 sps:$4 sm:$0xff]  }
  0x1b   :  { %354 = vmatprep.subr.bf16.mxu1 %v441_v0  ;;  %v72_v28 = vld [vmem:[%s499_s0] sm:$0xff]  ;;  %v73_v31 = vld [vmem:[%s499_s0 + $0x8] sm:$0xff]  ;;  %v74_v47 = vld [vmem:[%s499_s0 + $0x10] sm:$0xff] }
  0x1c   :  { %v340_v42 = vld [vmem:[%s502_s3] ss:$0 sm:$0xff] }
  0x1d   :  { %209 = vmatpush1.bf16.msra.mxu0 %v384_v8 }
  0x1e   :  { %210 = vmatprep.subr.bf16.mxu0 %v385_v9  ;;  %355 = vmatpush3.bf16.msra.mxu1 %v396_v13 }
  0x1f   :  { %356 = vmatprep.subr.bf16.mxu1 %v441_v0 }
  0x21   :  { %211 = vmatpush1.bf16.msra.mxu0 %v387_v11 }
  0x22   :  { %212 = vmatprep.subr.bf16.mxu0 %v389_v12  ;;  %357 = vmatpush3.bf16.msra.mxu1 %v400_v16 }
  0x23   :  { %358 = vmatprep.subr.bf16.mxu1 %v441_v0 }
  0x25   :  { %213 = vmatpush1.bf16.msra.mxu0 %v391_v14 }
  0x26   :  { %214 = vmatprep.subr.bf16.mxu0 %v393_v15  ;;  %359 = vmatpush3.bf16.msra.mxu1 %v404_v19 }
  0x27   :  { %360 = vmatprep.subr.bf16.mxu1 %v441_v0 }
  0x29   :  { %215 = vmatpush1.bf16.msra.mxu0 %v395_v17 }
  0x2a   :  { %216 = vmatprep.subr.bf16.mxu0 %v397_v18  ;;  %361 = vmatpush3.bf16.msra.mxu1 %v405_v22 }
  0x2b   :  { %362 = vmatprep.subr.bf16.mxu1 %v441_v0 }
  0x2d   :  { %217 = vmatpush1.bf16.msra.mxu0 %v399_v20 }
  0x2e   :  { %218 = vmatprep.subr.bf16.mxu0 %v401_v21  ;;  %363 = vmatpush3.bf16.msra.mxu1 %v406_v25 }
  0x2f   :  { %364 = vmatprep.subr.bf16.mxu1 %v441_v0 }
  0x31   :  { %219 = vmatpush1.bf16.msra.mxu0 %v403_v23 }
  0x32   :  { %365 = vmatpush3.bf16.msra.mxu1 %v407_v27 }
  0x34   :  { %237 = vmatmul.mubr.bf16.vlgmr.msra.gmra.mrb[0].mxu0 %v75_v26 }
  0x35   :  { %367 = vmatmul.mubr.bf16.vlgmr.msra.gmra.mrb[0].mxu1 %v75_v26 }
 0x107   :  { %v238_v29 = vpop.f32.mrb[0].mxu0 }
 0x108   :  { %v285_v30 = vadd.f32 %v238_v29, %v72_v28  ;;  %v240_v32 = vpop.f32.mrb[1].mxu0  ;;  %v279_v37 = vpop.f32.mrb[0].mxu1 }
 0x109   :  { %v242_v33 = vpop.f32.mrb[2].mxu0  ;;  %v290_v36 = vadd.f32 %v240_v32, %v73_v31  ;;  %v368_v38 = vpop.f32.mrb[1].mxu1  ;;  %v301_v45 = vadd.f32 %v340_v42, %v279_v37 }
 0x10a   :  { %v286_v34 = vmul.f32 0.5, %v285_v30  ;;  %v243_v35 = vpop.f32.mrb[3].mxu0  ;;  %v282_v39 = vpop.f32.mrb[2].mxu1 }
 0x10b   :  { %v291_v40 = vmul.f32 0.5, %v290_v36  ;;  %v369_v41 = vpop.f32.mrb[3].mxu1 }
 0x10c   :  { %408 = vtanh.f32 %v286_v34 }
 0x10d   :  { %410 = vtanh.f32 %v291_v40 }
 0x116   :  { %v409_v43 = vpop.eup %408 }
 0x117   :  { %v288_v44 = vmul.f32 0.5, %v409_v43  ;;  %v411_v49 = vpop.eup %410 }
 0x118   :  { %v293_v51 = vmul.f32 0.5, %v411_v49 }
 0x119   :  { %v289_v46 = vadd.f32 0.5, %v288_v44 }
 0x11a   :  { %v294_v52 = vadd.f32 0.5, %v293_v51 }
 0x11b   :  { %v302_v48 = vmul.f32 %v301_v45, %v289_v46 }
 0x11c   :  { %v305_v53 = vsub.f32 1.0, %v294_v52  ;;  %v307_v55 = vmul.f32 %v294_v52, %v36_v24 }
 0x11d   :  { %v303_v50 = vadd.f32 %v302_v48, %v74_v47 }
 0x11f   :  { %412 = vtanh.f32 %v303_v50 }
 0x129   :  { %v413_v54 = vpop.eup %412 }
 0x12a   :  { %v306_v56 = vmul.f32 %v413_v54, %v305_v53 }
 0x12c   :  { %v308_v57 = vadd.f32 %v307_v55, %v306_v56 }
 0x12e   :  { %309 = vst [vmem:[%s503_s4] sm:$0xff] %v308_v57 }
 0x12f   :  { %315 = vsyncpa [#allocation4], 1 }

</bundles_post_ra>
